<compile_context>
chip_gen: v7x
topology: tpu7x:2x2x1
jax: 0.10.0
libtpu: 0.0.40
codegen_flags: <defaults>
</compile_context>

<pallas_src>
import functools

import jax
import jax.numpy as jnp
from jax.experimental import pallas as pl
from jax.experimental.pallas import tpu as pltpu

HIDDEN = 256
TB_DEFAULT = 4096                 # baseline batch tile (review: amortize step overhead)
VMEM_LIMIT = 48 * 1024 * 1024     # explicit scoped-VMEM cap; ~14 MiB used at tb=4096


def _round_up(x, m):
    return (x + m - 1) // m * m


def actor_kernel(x_ref, w1_ref, b1_ref, w2_ref, b2_ref, w3_ref, b3_ref, o_ref):
    # Cast activations to bf16 only where the MXU consumes them; bias adds,
    # relu and tanh stay f32 on the VPU/EUP.
    x = x_ref[...].astype(jnp.bfloat16)

    # layer 1: Linear(state_size, 256) + relu
    h1 = jnp.dot(x, w1_ref[...], preferred_element_type=jnp.float32) + b1_ref[...]
    h1 = jnp.maximum(h1, 0.0).astype(jnp.bfloat16)   # early bf16: halves live footprint

    # layer 2: Linear(256, 256) + relu
    h2 = jnp.dot(h1, w2_ref[...], preferred_element_type=jnp.float32) + b2_ref[...]
    h2 = jnp.maximum(h2, 0.0).astype(jnp.bfloat16)

    # layer 3: Linear(256, action_size) + tanh — narrow output, 16x fewer HBM bytes
    out = jnp.dot(h2, w3_ref[...], preferred_element_type=jnp.float32) + b3_ref[...]
    o_ref[...] = jnp.tanh(out).astype(o_ref.dtype)


def actor_forward(state, params, tb=None):
    """state: [B, state_size] f32. Returns [B, action_size] f32."""
    w1, b1 = params["w1"], params["b1"]
    w2, b2 = params["w2"], params["b2"]
    w3, b3 = params["w3"], params["b3"]
    B, state_size = state.shape
    action_size = w3.shape[1]

    # Batch tile: big by default (amortizes ~0.35 µs/step grid overhead); never
    # larger than needed for small batches.  B > tb gives >=2 grid steps so the
    # "parallel" axis can shard across v7x's two TensorCores.
    if tb is None:
        tb = TB_DEFAULT
    tb = min(_round_up(B, 8), _round_up(tb, 8))
    grid = (pl.cdiv(B, tb),)     # ragged tail handled by Pallas (no jnp.pad pass)

    const = lambda i: (0, 0)     # weights/biases: same block every step -> VMEM-resident

    return pl.pallas_call(
        actor_kernel,
        out_shape=jax.ShapeDtypeStruct((B, action_size), jnp.float32),
        grid=grid,
        in_specs=[
            pl.BlockSpec((tb, state_size), lambda i: (i, 0)),   # state tile
            pl.BlockSpec((state_size, HIDDEN), const),          # w1 (bf16)
            pl.BlockSpec((1, HIDDEN), const),                   # b1 (f32)
            pl.BlockSpec((HIDDEN, HIDDEN), const),              # w2 (bf16)
            pl.BlockSpec((1, HIDDEN), const),                   # b2 (f32)
            pl.BlockSpec((HIDDEN, action_size), const),         # w3 (bf16, narrow)
            pl.BlockSpec((1, action_size), const),              # b3 (f32, narrow)
        ],
        out_specs=pl.BlockSpec((tb, action_size), lambda i: (i, 0)),
        compiler_params=pltpu.CompilerParams(
            dimension_semantics=("parallel",),
            vmem_limit_bytes=VMEM_LIMIT,
        ),
    )(state, w1, b1, w2, b2, w3, b3)


def init_actor_params(state_size, action_size, key):
    """PyTorch-Linear-like uniform fan-in init; weights stored [in, out]."""
    ks = jax.random.split(key, 6)

    def linear(kw, kb, fan_in, fan_out):
        bound = 1.0 / (fan_in ** 0.5)
        w = jax.random.uniform(kw, (fan_in, fan_out), jnp.float32, -bound, bound)
        b = jax.random.uniform(kb, (1, fan_out), jnp.float32, -bound, bound)
        return w, b

    w1, b1 = linear(ks[0], ks[1], state_size, HIDDEN)
    w2, b2 = linear(ks[2], ks[3], HIDDEN, HIDDEN)
    w3, b3 = linear(ks[4], ks[5], HIDDEN, action_size)

    return dict(
        # kernel params: bf16 weights (halved HBM traffic, native MXU path),
        # f32 biases; output layer kept narrow (no 128-lane pad).
        w1=w1.astype(jnp.bfloat16), b1=b1,
        w2=w2.astype(jnp.bfloat16), b2=b2,
        w3=w3.astype(jnp.bfloat16), b3=b3,
        # full-precision originals kept for the plain-JAX reference.
        w1_f32=w1, w2_f32=w2, w3_f32=w3,
    )


def actor_forward_ref(state, params):
    """Plain-JAX f32 reference for correctness checking."""
    h1 = jnp.maximum(state @ params["w1_f32"] + params["b1"], 0.0)
    h2 = jnp.maximum(h1 @ params["w2_f32"] + params["b2"], 0.0)
    return jnp.tanh(h2 @ params["w3_f32"] + params["b3"])


if __name__ == "__main__":
    state_size = 32
    action_size = 8

    key = jax.random.PRNGKey(0)
    k1, k2, k3, kp = jax.random.split(key, 4)
    params = init_actor_params(state_size, action_size, kp)

    # small-batch case (single grid step)
    s1 = jax.random.normal(k1, (8, state_size), dtype=jnp.float32)
    o1 = jax.block_until_ready(actor_forward(s1, params))
    r1 = actor_forward_ref(s1, params)
    assert o1.shape == (8, action_size)
    assert jnp.allclose(o1, r1, atol=3e-2, rtol=3e-2), float(jnp.max(jnp.abs(o1 - r1)))

    # gridded case (multiple batch tiles, weights resident across steps)
    s2 = jax.random.normal(k2, (64, state_size), dtype=jnp.float32)
    o2 = jax.block_until_ready(actor_forward(s2, params, tb=16))
    r2 = actor_forward_ref(s2, params)
    assert o2.shape == (64, action_size)
    assert jnp.allclose(o2, r2, atol=3e-2, rtol=3e-2), float(jnp.max(jnp.abs(o2 - r2)))

    # ragged-tail case (B not a multiple of tb; no wrapper-side padding pass)
    s3 = jax.random.normal(k3, (20, state_size), dtype=jnp.float32)
    o3 = jax.block_until_ready(actor_forward(s3, params, tb=16))
    r3 = actor_forward_ref(s3, params)
    assert o3.shape == (20, action_size)
    assert jnp.allclose(o3, r3, atol=3e-2, rtol=3e-2), float(jnp.max(jnp.abs(o3 - r3)))

    print("KERNEL_OK")
</pallas_src>

<mosaic_0001>
module attributes {stable_mosaic.version = 11 : i64} {
  func.func @actor_kernel(%arg0: i32, %arg1: memref<8x32xf32, #tpu.memory_space<vmem>>, %arg2: memref<32x256xbf16, #tpu.memory_space<vmem>>, %arg3: memref<1x256xf32, #tpu.memory_space<vmem>>, %arg4: memref<256x256xbf16, #tpu.memory_space<vmem>>, %arg5: memref<1x256xf32, #tpu.memory_space<vmem>>, %arg6: memref<256x8xbf16, #tpu.memory_space<vmem>>, %arg7: memref<1x8xf32, #tpu.memory_space<vmem>>, %arg8: memref<8x8xf32, #tpu.memory_space<vmem>>) attributes {dimension_semantics = [#tpu.dimension_semantics<parallel>], iteration_bounds = array<i64: 1>, scalar_prefetch = 0 : i64, scratch_operands = 0 : i64, tpu.core_type = #tpu.core_type<tc>, window_params = [{transform_indices = @transform_0, window_bounds = array<i64: 8, 32>}, {pipeline_mode = #tpu.pipeline_mode<synchronous>, transform_indices = @transform_1, window_bounds = array<i64: 32, 256>}, {pipeline_mode = #tpu.pipeline_mode<synchronous>, transform_indices = @transform_2, window_bounds = array<i64: 1, 256>}, {pipeline_mode = #tpu.pipeline_mode<synchronous>, transform_indices = @transform_3, window_bounds = array<i64: 256, 256>}, {pipeline_mode = #tpu.pipeline_mode<synchronous>, transform_indices = @transform_4, window_bounds = array<i64: 1, 256>}, {pipeline_mode = #tpu.pipeline_mode<synchronous>, transform_indices = @transform_5, window_bounds = array<i64: 256, 8>}, {pipeline_mode = #tpu.pipeline_mode<synchronous>, transform_indices = @transform_6, window_bounds = array<i64: 1, 8>}, {transform_indices = @transform_7, window_bounds = array<i64: 8, 8>}]} {
    %c0 = arith.constant 0 : index
    %c0_0 = arith.constant 0 : index
    %0 = vector.load %arg1[%c0, %c0_0] : memref<8x32xf32, #tpu.memory_space<vmem>>, vector<8x32xf32>
    %1 = arith.truncf %0 : vector<8x32xf32> to vector<8x32xbf16>
    %c0_1 = arith.constant 0 : index
    %c0_2 = arith.constant 0 : index
    %2 = vector.load %arg2[%c0_1, %c0_2] : memref<32x256xbf16, #tpu.memory_space<vmem>>, vector<32x256xbf16>
    %cst = arith.constant dense<0.000000e+00> : vector<8x256xf32>
    %3 = tpu.matmul %1, %2, %cst {dimension_numbers = #tpu.dot_dimension_numbers<[1], [0], [0], [1], [0, 0, 1, 1], [], []>} : vector<8x32xbf16>, vector<32x256xbf16>, vector<8x256xf32> -> vector<8x256xf32>
    %c0_3 = arith.constant 0 : index
    %c0_4 = arith.constant 0 : index
    %4 = vector.load %arg3[%c0_3, %c0_4] : memref<1x256xf32, #tpu.memory_space<vmem>>, vector<1x256xf32>
    %5 = vector.broadcast %4 : vector<1x256xf32> to vector<8x256xf32>
    %6 = arith.addf %3, %5 : vector<8x256xf32>
    %cst_5 = arith.constant 0.000000e+00 : f32
    %7 = vector.broadcast %cst_5 : f32 to vector<8x256xf32>
    %8 = arith.maximumf %6, %7 : vector<8x256xf32>
    %9 = arith.truncf %8 : vector<8x256xf32> to vector<8x256xbf16>
    %c0_6 = arith.constant 0 : index
    %c0_7 = arith.constant 0 : index
    %10 = vector.load %arg4[%c0_6, %c0_7] : memref<256x256xbf16, #tpu.memory_space<vmem>>, vector<256x256xbf16>
    %cst_8 = arith.constant dense<0.000000e+00> : vector<8x256xf32>
    %11 = tpu.matmul %9, %10, %cst_8 {dimension_numbers = #tpu.dot_dimension_numbers<[1], [0], [0], [1], [0, 0, 1, 1], [], []>} : vector<8x256xbf16>, vector<256x256xbf16>, vector<8x256xf32> -> vector<8x256xf32>
    %c0_9 = arith.constant 0 : index
    %c0_10 = arith.constant 0 : index
    %12 = vector.load %arg5[%c0_9, %c0_10] : memref<1x256xf32, #tpu.memory_space<vmem>>, vector<1x256xf32>
    %13 = vector.broadcast %12 : vector<1x256xf32> to vector<8x256xf32>
    %14 = arith.addf %11, %13 : vector<8x256xf32>
    %cst_11 = arith.constant 0.000000e+00 : f32
    %15 = vector.broadcast %cst_11 : f32 to vector<8x256xf32>
    %16 = arith.maximumf %14, %15 : vector<8x256xf32>
    %17 = arith.truncf %16 : vector<8x256xf32> to vector<8x256xbf16>
    %c0_12 = arith.constant 0 : index
    %c0_13 = arith.constant 0 : index
    %18 = vector.load %arg6[%c0_12, %c0_13] : memref<256x8xbf16, #tpu.memory_space<vmem>>, vector<256x8xbf16>
    %cst_14 = arith.constant dense<0.000000e+00> : vector<8x8xf32>
    %19 = tpu.matmul %17, %18, %cst_14 {dimension_numbers = #tpu.dot_dimension_numbers<[1], [0], [0], [1], [0, 0, 1, 1], [], []>} : vector<8x256xbf16>, vector<256x8xbf16>, vector<8x8xf32> -> vector<8x8xf32>
    %c0_15 = arith.constant 0 : index
    %c0_16 = arith.constant 0 : index
    %20 = vector.load %arg7[%c0_15, %c0_16] : memref<1x8xf32, #tpu.memory_space<vmem>>, vector<1x8xf32>
    %21 = vector.broadcast %20 : vector<1x8xf32> to vector<8x8xf32>
    %22 = arith.addf %19, %21 : vector<8x8xf32>
    %23 = math.tanh %22 : vector<8x8xf32>
    %c0_17 = arith.constant 0 : index
    %c0_18 = arith.constant 0 : index
    %24 = vector.load %arg8[%c0_17, %c0_18] : memref<8x8xf32, #tpu.memory_space<vmem>>, vector<8x8xf32>
    tpu.vector_store %arg8[%c0_17, %c0_18], %23 {strides = array<i32>} : memref<8x8xf32, #tpu.memory_space<vmem>>, vector<8x8xf32>,
    return
  }
  func.func @transform_0(%arg0: i32) -> (i32, i32) {
    %c0_i32 = arith.constant 0 : i32
    %c0_i32_0 = arith.constant 0 : i32
    return %arg0, %c0_i32 : i32, i32
  }
  func.func @transform_1(%arg0: i32) -> (i32, i32) {
    %c0_i32 = arith.constant 0 : i32
    %c0_i32_0 = arith.constant 0 : i32
    %c0_i32_1 = arith.constant 0 : i32
    return %c0_i32, %c0_i32_0 : i32, i32
  }
  func.func @transform_2(%arg0: i32) -> (i32, i32) {
    %c0_i32 = arith.constant 0 : i32
    %c0_i32_0 = arith.constant 0 : i32
    %c0_i32_1 = arith.constant 0 : i32
    return %c0_i32, %c0_i32_0 : i32, i32
  }
  func.func @transform_3(%arg0: i32) -> (i32, i32) {
    %c0_i32 = arith.constant 0 : i32
    %c0_i32_0 = arith.constant 0 : i32
    %c0_i32_1 = arith.constant 0 : i32
    return %c0_i32, %c0_i32_0 : i32, i32
  }
  func.func @transform_4(%arg0: i32) -> (i32, i32) {
    %c0_i32 = arith.constant 0 : i32
    %c0_i32_0 = arith.constant 0 : i32
    %c0_i32_1 = arith.constant 0 : i32
    return %c0_i32, %c0_i32_0 : i32, i32
  }
  func.func @transform_5(%arg0: i32) -> (i32, i32) {
    %c0_i32 = arith.constant 0 : i32
    %c0_i32_0 = arith.constant 0 : i32
    %c0_i32_1 = arith.constant 0 : i32
    return %c0_i32, %c0_i32_0 : i32, i32
  }
  func.func @transform_6(%arg0: i32) -> (i32, i32) {
    %c0_i32 = arith.constant 0 : i32
    %c0_i32_0 = arith.constant 0 : i32
    %c0_i32_1 = arith.constant 0 : i32
    return %c0_i32, %c0_i32_0 : i32, i32
  }
  func.func @transform_7(%arg0: i32) -> (i32, i32) {
    %c0_i32 = arith.constant 0 : i32
    %c0_i32_0 = arith.constant 0 : i32
    return %arg0, %c0_i32 : i32, i32
  }
}

</mosaic_0001>

<bundles_post_ra>
// kernel: tpu_custom_call.1
= control target key start
LH: loop header
LB: loop body
LE: loop exit
PB: predicated region body
PF: predicated region fallthrough
CT: control target
= control target key end

     0   :  { %12 = vsyncpa [#allocation3], 0  ;;  %s913_s0 = inlined_call_operand.vmem [shape: f32[8,32], index: 0, kind: input, shape index: {}]   ;;  %s914_s1 = inlined_call_operand.vmem [shape: bf16[32,256], index: 1, kind: input, shape index: {}]   ;;  %s915_s2 = inlined_call_operand.vmem [shape: f32[1,256], index: 2, kind: input, shape index: {}]   ;;  %s916_s3 = inlined_call_operand.hbm [shape: bf16[256,256], index: 3, kind: input, shape index: {}]   ;;  %s917_s4 = inlined_call_operand.vmem [shape: f32[1,256], index: 4, kind: input, shape index: {}]   ;;  %s918_s5 = inlined_call_operand.vmem [shape: bf16[256,8], index: 5, kind: input, shape index: {}]   ;;  %s919_s6 = inlined_call_operand.vmem [shape: f32[1,8], index: 6, kind: input, shape index: {}]   ;;  %s920_s7 = inlined_call_operand.hbm [shape: f32[8,8], index: 7, kind: output, shape index: {}]  }
   0x1   :  { %13 = vsyncpa [#allocation4], 0  ;;  %s772_s24 = smov [#allocation2]   ;;  %s724_s28 = scalar_lea.hbm %s916_s3, 4096 }
   0x2   :  { %s25_s25 = sshll.u32 %s772_s24, 4  ;;  %p725_p0 = scmp.ne.s32.totalorder %s916_s3, %s724_s28  ;;  %s26_s25 = int_to_ptr.vmem [resolvable:$true] %s25_s25 }
   0x3   :  { %p728_p1 = scmp.lt.u32.totalorder %s724_s28, %s916_s3 }
   0x5   :  { %p730_p2 = pnand %p728_p1, %p725_p0 }
   0x7   :  { %733 = shalt.err (!%p730_p2)
}
   0x8   :  { %s734_s10 = scalar_lea.vmem %s26_s25, 4096  ;;  %p739_p4 = scmp.lt.s32.totalorder %s26_s25, %s26_s25 }
   0x9   :  { %p735_p3 = scmp.ne.s32.totalorder %s26_s25, %s734_s10  ;;  %p740_p5 = scmp.lt.s32.totalorder %s734_s10, %s734_s10 }
   0xb   :  { %p741_p6 = por %p740_p5, %p739_p4 }
   0xd   :  { %p742_p7 = pnand %p741_p6, %p735_p3 }
   0xf   :  { %745 = shalt.err (!%p742_p7)
}
  0x10   :  { %s773_s11 = smov 128   ;;  %s774_s12 = smov 8  }
  0x11   :  { %31 = dma.hbm_to_vmem [thread:$0]  %s916_s3, 4096, %s26_s25, [#allocation3], %s773_s11, %s773_s11, %s774_s12  }
  0x12   :  { %768 = dma.done.wait [#allocation3], 4096  }
  0x13   :  { %769 = vsyncadd [#allocation3], 4294963200  ;;  %v775_v0 = vmov 0   ;;  %v652_v1 = vld [vmem:[%s914_s1 + $0x4] ss:$8 sps:$4 sm:$0xff]   ;;  %vm80_vm0 = vcmask 261120   ;;  %v50_v51 = vlaneseq }
  0x14   :  { %116 = vmatprep.mubr.bf16.mxu0 %v775_v0  ;;  %v654_v2 = vld [vmem:[%s914_s1] ss:$8 sps:$4 sm:$0xff]   ;;  %84 = vmatprep.subr.bf16.mxu0 %v652_v1  ;;  %v655_v3 = vld [vmem:[%s914_s1 + $0x14] ss:$8 sps:$4 sm:$0xff]   ;;  %v657_v4 = vld [vmem:[%s914_s1 + $0x10] ss:$8 sps:$4 sm:$0xff]  }
  0x15   :  { %v42_v5 = vld [vmem:[%s913_s0] sm:$0xff]  ;;  %85 = vmatpush1.bf16.msra.mxu0 %v654_v2  ;;  %v661_v8 = vld [vmem:[#allocation2 + $0x14] ss:$8 sps:$4 sm:$0xff]   ;;  %v663_v10 = vld [vmem:[#allocation2 + $0x10] ss:$8 sps:$4 sm:$0xff]   ;;  %v51_v52 = vshrl.u32 %v50_v51, 7 }
  0x16   :  { %v658_v6 = vld [vmem:[#allocation2 + $0x4] ss:$8 sps:$4 sm:$0xff]   ;;  %86 = vmatprep.subr.bf16.mxu0 %v655_v3  ;;  %v660_v7 = vld [vmem:[#allocation2] ss:$8 sps:$4 sm:$0xff]   ;;  %v43_v9 = vpack.c.bf16 %v42_v5, %v42_v5  ;;  %v667_v13 = vld [vmem:[#allocation2 + $0x34] ss:$8 sps:$4 sm:$0xff]  }
  0x17   :  { %333 = vmatprep.subr.bf16.mxu1 %v658_v6  ;;  %v664_v11 = vld [vmem:[#allocation2 + $0x24] ss:$8 sps:$4 sm:$0xff]   ;;  %v666_v12 = vld [vmem:[#allocation2 + $0x20] ss:$8 sps:$4 sm:$0xff]   ;;  %v669_v14 = vld [vmem:[#allocation2 + $0x30] ss:$8 sps:$4 sm:$0xff]  }
  0x18   :  { %334 = vmatpush1.bf16.msra.mxu1 %v660_v7  ;;  %v670_v15 = vld [vmem:[#allocation2 + $0x44] ss:$8 sps:$4 sm:$0xff]   ;;  %v672_v16 = vld [vmem:[#allocation2 + $0x40] ss:$8 sps:$4 sm:$0xff]   ;;  %v673_v17 = vld [vmem:[#allocation2 + $0x54] ss:$8 sps:$4 sm:$0xff]  }
  0x19   :  { %87 = vmatpush1.bf16.msra.mxu0 %v657_v4  ;;  %335 = vmatprep.subr.bf16.mxu1 %v661_v8  ;;  %v675_v18 = vld [vmem:[#allocation2 + $0x50] ss:$8 sps:$4 sm:$0xff]   ;;  %v676_v19 = vld [vmem:[#allocation2 + $0x64] ss:$8 sps:$4 sm:$0xff]   ;;  %v678_v20 = vld [vmem:[#allocation2 + $0x60] ss:$8 sps:$4 sm:$0xff]  }
  0x1a   :  { %v679_v21 = vld [vmem:[#allocation2 + $0x74] ss:$8 sps:$4 sm:$0xff]   ;;  %v681_v22 = vld [vmem:[#allocation2 + $0x70] ss:$8 sps:$4 sm:$0xff]   ;;  %v682_v23 = vld [vmem:[#allocation2 + $0x84] ss:$8 sps:$4 sm:$0xff]  }
  0x1b   :  { %v684_v24 = vld [vmem:[#allocation2 + $0x80] ss:$8 sps:$4 sm:$0xff]   ;;  %v685_v25 = vld [vmem:[#allocation2 + $0x94] ss:$8 sps:$4 sm:$0xff]   ;;  %v687_v26 = vld [vmem:[#allocation2 + $0x90] ss:$8 sps:$4 sm:$0xff]  }
  0x1c   :  { %575 = vmatmul.mubr.msk.bf16.vlgmr.msra.gmra.mrb[0].mxu0 %vm80_vm0, %v43_v9  ;;  %336 = vmatpush1.bf16.msra.mxu1 %v663_v10  ;;  %v688_v27 = vld [vmem:[#allocation2 + $0xa4] ss:$8 sps:$4 sm:$0xff]   ;;  %v690_v28 = vld [vmem:[#allocation2 + $0xa0] ss:$8 sps:$4 sm:$0xff]   ;;  %v691_v29 = vld [vmem:[#allocation2 + $0xb4] ss:$8 sps:$4 sm:$0xff]  }
  0x1d   :  { %337 = vmatprep.subr.bf16.mxu1 %v664_v11  ;;  %v693_v30 = vld [vmem:[#allocation2 + $0xb0] ss:$8 sps:$4 sm:$0xff]   ;;  %v694_v31 = vld [vmem:[#allocation2 + $0xc4] ss:$8 sps:$4 sm:$0xff]   ;;  %v696_v32 = vld [vmem:[#allocation2 + $0xc0] ss:$8 sps:$4 sm:$0xff]  }
  0x1e   :  { %v697_v33 = vld [vmem:[#allocation2 + $0xd4] ss:$8 sps:$4 sm:$0xff]   ;;  %v699_v34 = vld [vmem:[#allocation2 + $0xd0] ss:$8 sps:$4 sm:$0xff]   ;;  %v700_v35 = vld [vmem:[#allocation2 + $0xe4] ss:$8 sps:$4 sm:$0xff]  }
  0x1f   :  { %v702_v36 = vld [vmem:[#allocation2 + $0xe0] ss:$8 sps:$4 sm:$0xff]   ;;  %v703_v37 = vld [vmem:[#allocation2 + $0xf4] ss:$8 sps:$4 sm:$0xff]   ;;  %v705_v38 = vld [vmem:[#allocation2 + $0xf0] ss:$8 sps:$4 sm:$0xff]  }
  0x20   :  { %338 = vmatpush1.bf16.msra.mxu1 %v666_v12  ;;  %v706_v39 = vld [vmem:[%s918_s5 + $0x40] sm:$0xff]   ;;  %v708_v41 = vld [vmem:[%s918_s5 + $0x48] sm:$0xff]   ;;  %v710_v43 = vld [vmem:[%s918_s5 + $0x50] sm:$0xff]   ;;  %v52_v53 = vsub.s32 0, %v51_v52  ;;  %v56_v55 = vsub.s32 1, %v51_v52  ;;  %vm554_vm1 = vcmask 64512  }
  0x21   :  { %339 = vmatprep.subr.bf16.mxu1 %v667_v13  ;;  %v707_v40 = vld [vmem:[%s918_s5] sm:$0xff]   ;;  %625 = vmatprep.subr.bf16.mxu0 %v706_v39  ;;  %v709_v42 = vld [vmem:[%s918_s5 + $0x8] sm:$0xff]   ;;  %v711_v44 = vld [vmem:[%s918_s5 + $0x10] sm:$0xff]  }
  0x22   :  { %626 = vmatpush3.bf16.msra.mxu0 %v707_v40  ;;  %v712_v45 = vld [vmem:[%s918_s5 + $0x58] sm:$0xff]   ;;  %v714_v47 = vld [vmem:[%s918_s5 + $0x60] sm:$0xff]   ;;  %v716_v49 = vld [vmem:[%s918_s5 + $0x68] sm:$0xff]  }
  0x23   :  { %627 = vmatprep.subr.bf16.mxu0 %v708_v41  ;;  %v713_v46 = vld [vmem:[%s918_s5 + $0x18] sm:$0xff]   ;;  %v715_v48 = vld [vmem:[%s918_s5 + $0x20] sm:$0xff]   ;;  %v717_v50 = vld [vmem:[%s918_s5 + $0x28] sm:$0xff]  }
  0x24   :  { %340 = vmatpush1.bf16.msra.mxu1 %v669_v14  ;;  %v48_v54 = vld [vmem:[%s915_s2] sm:$0x3]  ;;  %v718_v4 = vld [vmem:[%s918_s5 + $0x70] sm:$0xff]   ;;  %v720_v6 = vld [vmem:[%s918_s5 + $0x78] sm:$0xff]  }
  0x25   :  { %341 = vmatprep.subr.bf16.mxu1 %v670_v15  ;;  %v53_v56 = vrot.slane %v48_v54, %v52_v53  ;;  %v57_v57 = vrot.slane %v48_v54, %v56_v55  ;;  %v719_v5 = vld [vmem:[%s918_s5 + $0x30] sm:$0xff]   ;;  %v721_v7 = vld [vmem:[%s918_s5 + $0x38] sm:$0xff]   ;;  %v161_v8 = vld [vmem:[%s917_s4] sm:$0x3]  ;;  %s776_s4 = smov [#allocation5]  }
  0x26   :  { %628 = vmatpush3.bf16.msra.mxu0 %v709_v42  ;;  %v166_v9 = vrot.slane %v161_v8, %v52_v53  ;;  %v170_v10 = vrot.slane %v161_v8, %v56_v55  ;;  %s562_s9 = sshll.u32 %s776_s4, 4  ;;  %s563_s9 = int_to_ptr.vmem [resolvable:$true] %s562_s9 }
  0x27   :  { %629 = vmatprep.subr.bf16.mxu0 %v710_v43  ;;  %s746_s10 = scalar_lea.vmem %s563_s9, 128  ;;  %p751_p9 = scmp.lt.s32.totalorder %s563_s9, %s563_s9 }
  0x28   :  { %342 = vmatpush1.bf16.msra.mxu1 %v672_v16  ;;  %p747_p8 = scmp.ne.s32.totalorder %s563_s9, %s746_s10  ;;  %p752_p10 = scmp.lt.s32.totalorder %s746_s10, %s746_s10 }
  0x29   :  { %343 = vmatprep.subr.bf16.mxu1 %v673_v17 }
  0x2a   :  { %630 = vmatpush3.bf16.msra.mxu0 %v711_v44  ;;  %p753_p11 = por %p752_p10, %p751_p9 }
  0x2b   :  { %631 = vmatprep.subr.bf16.mxu0 %v712_v45 }
  0x2c   :  { %344 = vmatpush1.bf16.msra.mxu1 %v675_v18  ;;  %p754_p12 = pnand %p753_p11, %p747_p8 }
  0x2d   :  { %345 = vmatprep.subr.bf16.mxu1 %v676_v19 }
  0x2e   :  { %632 = vmatpush3.bf16.msra.mxu0 %v713_v46 }
  0x2f   :  { %633 = vmatprep.subr.bf16.mxu0 %v714_v47 }
  0x30   :  { %346 = vmatpush1.bf16.msra.mxu1 %v678_v20 }
  0x31   :  { %347 = vmatprep.subr.bf16.mxu1 %v679_v21 }
  0x32   :  { %634 = vmatpush3.bf16.msra.mxu0 %v715_v48 }
  0x33   :  { %635 = vmatprep.subr.bf16.mxu0 %v716_v49 }
  0x34   :  { %348 = vmatpush1.bf16.msra.mxu1 %v681_v22  ;;  %v608_v22 = vld [vmem:[%s919_s6] ss:$0 sm:$0xff] }
  0x35   :  { %349 = vmatprep.subr.bf16.mxu1 %v682_v23 }
  0x36   :  { %636 = vmatpush3.bf16.msra.mxu0 %v717_v50 }
  0x37   :  { %637 = vmatprep.subr.bf16.mxu0 %v718_v4 }
  0x38   :  { %350 = vmatpush1.bf16.msra.mxu1 %v684_v24 }
  0x39   :  { %351 = vmatprep.subr.bf16.mxu1 %v685_v25 }
  0x3a   :  { %638 = vmatpush3.bf16.msra.mxu0 %v719_v5 }
  0x3b   :  { %639 = vmatprep.subr.bf16.mxu0 %v720_v6 }
  0x3c   :  { %352 = vmatpush1.bf16.msra.mxu1 %v687_v26 }
  0x3d   :  { %353 = vmatprep.subr.bf16.mxu1 %v688_v27 }
  0x3e   :  { %640 = vmatpush3.bf16.msra.mxu0 %v721_v7 }
  0x40   :  { %354 = vmatpush1.bf16.msra.mxu1 %v690_v28 }
  0x41   :  { %355 = vmatprep.subr.bf16.mxu1 %v691_v29 }
  0x44   :  { %356 = vmatpush1.bf16.msra.mxu1 %v693_v30 }
  0x45   :  { %357 = vmatprep.subr.bf16.mxu1 %v694_v31 }
  0x48   :  { %358 = vmatpush1.bf16.msra.mxu1 %v696_v32 }
  0x49   :  { %359 = vmatprep.subr.bf16.mxu1 %v697_v33 }
  0x4c   :  { %360 = vmatpush1.bf16.msra.mxu1 %v699_v34 }
  0x4d   :  { %361 = vmatprep.subr.bf16.mxu1 %v700_v35 }
  0x50   :  { %362 = vmatpush1.bf16.msra.mxu1 %v702_v36 }
  0x51   :  { %363 = vmatprep.subr.bf16.mxu1 %v703_v37 }
  0x54   :  { %364 = vmatpush1.bf16.msra.mxu1 %v705_v38 }
  0xef   :  { %v118_v58 = vpop.f32.mrb[0].mxu0 }
  0xf0   :  { %v119_v59 = vadd.f32 %v118_v58, %v53_v56  ;;  %v120_v60 = vpop.f32.mrb[1].mxu0 }
  0xf1   :  { %v121_v61 = vadd.f32 %v120_v60, %v57_v57  ;;  %v122_v62 = vpop.f32.mrb[2].mxu0 }
  0xf2   :  { %v125_v63 = vmax.f32 %v119_v59, 0.0  ;;  %v123_v0 = vpop.f32.mrb[3].mxu0 }
  0xf3   :  { %v126_v1 = vmax.f32 %v121_v61, 0.0 }
  0xf4   :  { %v127_v3 = vpack.c.bf16 %v125_v63, %v125_v63 }
  0xf5   :  { %v128_v2 = vpack.c.bf16 %v126_v1, %v126_v1 }
  0xf7   :  { %365 = vmatprep.mubr.bf16.mxu1 %v128_v2 }
  0xf8   :  { %366 = vmatmul.mubr.bf16.vlgmr.msra.gmra.mrb[0].mxu1 %v127_v3 }
 0x1cb   :  { %v367_v11 = vpop.f32.mrb[0].mxu1 }
 0x1cc   :  { %v368_v12 = vadd.f32 %v367_v11, %v166_v9  ;;  %v369_v13 = vpop.f32.mrb[1].mxu1 }
 0x1cd   :  { %v370_v14 = vadd.f32 %v369_v13, %v170_v10  ;;  %v371_v15 = vpop.f32.mrb[2].mxu1 }
 0x1ce   :  { %v374_v16 = vmax.f32 %v368_v12, 0.0  ;;  %v372_v17 = vpop.f32.mrb[3].mxu1 }
 0x1cf   :  { %v375_v18 = vmax.f32 %v370_v14, 0.0 }
 0x1d0   :  { %v376_v20 = vpack.c.bf16 %v374_v16, %v374_v16 }
 0x1d1   :  { %v377_v19 = vpack.c.bf16 %v375_v18, %v375_v18 }
 0x1d3   :  { %545 = vmatprep.mubr.bf16.mxu0 %v377_v19 }
 0x1d4   :  { %546 = vmatmul.mubr.bf16.vlgmr.msra.gmra.mrb[4].mxu0 %v376_v20 }
 0x2a7   :  { %v641_v21 = vpop.f32.mrb[4].mxu0 }
 0x2a8   :  { %v642_v23 = vpop.f32.mrb[5].mxu0 }
 0x2a9   :  { %v643_v24 = vadd.f32 %v642_v23, %v641_v21  ;;  %v644_v25 = vpop.f32.mrb[6].mxu0 }
 0x2aa   :  { %v645_v26 = vpop.f32.mrb[7].mxu0 }
 0x2ab   :  { %v548_v27 = vadd.f32 %v643_v24, %v608_v22 }
 0x2ad   :  { %722 = vtanh.f32 %v548_v27 }
 0x2b7   :  { %v723_v28 = vpop.eup %722 }
 0x2b8   :  { %555 = vst.msk [vmem:[#allocation5] sm:$0xff] %vm554_vm1, %v723_v28 }
 0x2b9   :  { %757 = shalt.err (!%p754_p12)
}
 0x2ba   :  { %s758_s12 = scalar_lea.hbm %s920_s7, 128 }
 0x2bb   :  { %p759_p13 = scmp.ne.s32.totalorder %s920_s7, %s758_s12  ;;  %p762_p0 = scmp.lt.u32.totalorder %s758_s12, %s920_s7 }
 0x2bd   :  { %p764_p1 = pnand %p762_p0, %p759_p13 }
 0x2bf   :  { %767 = shalt.err (!%p764_p1)
}
 0x2c0   :  { %565 = dma.vmem_to_hbm [thread:$0]  %s563_s9, 128, %s920_s7, [#allocation4]  }
 0x2c1   :  { %770 = dma.done.wait [#allocation4], 128  }
 0x2c2   :  { %771 = vsyncadd [#allocation4], 4294967168 }
 0x2c3   :  { %569 = vsyncpa [#allocation3], 1 }
 0x2c4   :  { %570 = vsyncpa [#allocation4], 1 }

</bundles_post_ra>
